<compile_context>
chip_gen: v6e
topology: v6e:2x2x1
jax: 0.10.0
libtpu: 0.0.40
codegen_flags: <defaults>
</compile_context>

<pallas_src>
import jax
import jax.numpy as jnp
from jax.experimental import pallas as pl
from jax.experimental.pallas import tpu as pltpu


def _lstm_pid_kernel(x_ref, wih_ref, whh_ref, b_ref, wlin_ref, blin_ref,
                     h0_ref, c0_ref,
                     pid_ref, hn_ref, cn_ref,
                     gx_ref):
    """Whole forward pass (LSTM recurrence + final linear + exp) in one kernel.

    x_ref:    (T*B, I)   time-major flattened input (row t*B + b <-> time t, batch b)
    wih_ref:  (I, 4H)    input->gates weights (transposed, PyTorch gate order i,f,g,o)
    whh_ref:  (H, 4H)    hidden->gates weights (transposed)
    b_ref:    (1, 4H)    combined bias (b_ih + b_hh)
    wlin_ref: (H, O)     final linear weight (transposed)
    blin_ref: (1, O)     final linear bias
    h0_ref:   (B, H)     initial hidden state
    c0_ref:   (B, H)     initial cell state
    pid_ref:  (B, O)     exp(linear(h_T))
    hn_ref:   (B, H)     final hidden state
    cn_ref:   (B, H)     final cell state
    gx_ref:   (T*B, 4H)  VMEM scratch for the hoisted input projection
    """
    B, H = h0_ref.shape
    T = x_ref.shape[0] // B
    H4 = 4 * H

    # Hoisted input projection + folded bias: one big matmul, off the serial path.
    gx_ref[...] = (jnp.dot(x_ref[...], wih_ref[...],
                           preferred_element_type=jnp.float32)
                   + b_ref[...])

    whh = whh_ref[...]
    h = h0_ref[...]
    c = c0_ref[...]

    # Fully unrolled recurrence: per step only h @ W_hh + whole-tile activations sit on the
    # serial h(t-1) -> h(t) dependency chain.
    for t in range(T):
        g_x = gx_ref[pl.ds(t * B, B), :]                        # (B, 4H), static offset load
        gates = g_x + jnp.dot(h, whh, preferred_element_type=jnp.float32)

        # Whole-vreg activations: 1 sigmoid + 1 tanh EUP push over the full (B, 4H) tile.
        sig = jax.nn.sigmoid(gates)
        tnh = jnp.tanh(gates)

        # Align each gate's lane group onto lanes [0, H) via XLU rolls + lane-prefix slices
        # (pltpu.roll matches jnp.roll semantics: element j moves to (j + shift) mod 4H).
        i_g = sig[:, :H]                                        # lanes [0,   H)
        f_g = pltpu.roll(sig, H4 - 1 * H, 1)[:, :H]             # lanes [H,  2H) -> [0, H)
        g_g = pltpu.roll(tnh, H4 - 2 * H, 1)[:, :H]             # lanes [2H, 3H) -> [0, H)
        o_g = pltpu.roll(sig, H4 - 3 * H, 1)[:, :H]             # lanes [3H, 4H) -> [0, H)

        c = f_g * c + i_g * g_g
        h = o_g * jnp.tanh(c)

    pid = jnp.dot(h, wlin_ref[...], preferred_element_type=jnp.float32) + blin_ref[...]
    pid_ref[...] = jnp.exp(pid)
    hn_ref[...] = h
    cn_ref[...] = c


def init_params(key, input_size, hidden_size, output_size):
    """Deterministic init mimicking PyTorch's uniform(-1/sqrt(H), 1/sqrt(H)) for LSTM
    and uniform(-1/sqrt(fan_in), 1/sqrt(fan_in)) for Linear."""
    k = 1.0 / jnp.sqrt(hidden_size)
    kl = 1.0 / jnp.sqrt(hidden_size)  # linear fan_in == hidden_size
    keys = jax.random.split(key, 6)
    w_ih = jax.random.uniform(keys[0], (4 * hidden_size, input_size), jnp.float32, -k, k)
    w_hh = jax.random.uniform(keys[1], (4 * hidden_size, hidden_size), jnp.float32, -k, k)
    b_ih = jax.random.uniform(keys[2], (4 * hidden_size,), jnp.float32, -k, k)
    b_hh = jax.random.uniform(keys[3], (4 * hidden_size,), jnp.float32, -k, k)
    w_lin = jax.random.uniform(keys[4], (output_size, hidden_size), jnp.float32, -kl, kl)
    b_lin = jax.random.uniform(keys[5], (output_size,), jnp.float32, -kl, kl)
    return dict(w_ih=w_ih, w_hh=w_hh, b_ih=b_ih, b_hh=b_hh, w_lin=w_lin, b_lin=b_lin)


def lstm_adaptive_pid_forward(params, x, hidden=None):
    """Matches LSTMAdaptivePID.forward:
       returns (exp(linear(lstm_out[:, -1, :])), (h_n, c_n)) with h_n, c_n of shape (1, B, H)."""
    B, T, I = x.shape
    H4, _ = params["w_ih"].shape
    H = H4 // 4
    O = params["w_lin"].shape[0]

    if hidden is None:
        h0 = jnp.zeros((B, H), jnp.float32)
        c0 = jnp.zeros((B, H), jnp.float32)
    else:
        h0 = hidden[0].reshape(B, H).astype(jnp.float32)
        c0 = hidden[1].reshape(B, H).astype(jnp.float32)

    # Layout plumbing (done by XLA outside the kernel): time-major flatten + weight transposes.
    x2d = jnp.transpose(x.astype(jnp.float32), (1, 0, 2)).reshape(T * B, I)   # (T*B, I)
    wih_t = params["w_ih"].T.astype(jnp.float32)                              # (I, 4H)
    whh_t = params["w_hh"].T.astype(jnp.float32)                              # (H, 4H)
    b = (params["b_ih"] + params["b_hh"]).reshape(1, 4 * H).astype(jnp.float32)
    wlin_t = params["w_lin"].T.astype(jnp.float32)                            # (H, O)
    blin = params["b_lin"].reshape(1, O).astype(jnp.float32)                  # (1, O)

    vmem = pl.BlockSpec(memory_space=pltpu.MemorySpace.VMEM)

    flops = 2 * T * B * I * 4 * H + 2 * T * B * H * 4 * H + 2 * B * H * O
    transcendentals = T * B * (2 * 4 * H + H) + B * O
    bytes_accessed = 4 * (x2d.size + wih_t.size + whh_t.size + b.size + wlin_t.size
                          + blin.size + h0.size + c0.size + B * O + 2 * B * H)

    pid, h_n, c_n = pl.pallas_call(
        _lstm_pid_kernel,
        out_shape=(
            jax.ShapeDtypeStruct((B, O), jnp.float32),
            jax.ShapeDtypeStruct((B, H), jnp.float32),
            jax.ShapeDtypeStruct((B, H), jnp.float32),
        ),
        in_specs=[vmem] * 8,
        out_specs=(vmem, vmem, vmem),
        scratch_shapes=[pltpu.VMEM((T * B, 4 * H), jnp.float32)],
        cost_estimate=pl.CostEstimate(
            flops=int(flops),
            transcendentals=int(transcendentals),
            bytes_accessed=int(bytes_accessed),
        ),
    )(x2d, wih_t, whh_t, b, wlin_t, blin, h0, c0)

    return pid, (h_n[None, :, :], c_n[None, :, :])


def _reference_forward(params, x, hidden=None):
    """Pure-JAX reference mirroring torch.nn.LSTM semantics (for a sanity check)."""
    B, T, I = x.shape
    H = params["w_ih"].shape[0] // 4
    h = jnp.zeros((B, H), jnp.float32) if hidden is None else hidden[0][0]
    c = jnp.zeros((B, H), jnp.float32) if hidden is None else hidden[1][0]
    wih, whh = params["w_ih"], params["w_hh"]
    b = params["b_ih"] + params["b_hh"]
    for t in range(T):
        gates = x[:, t, :] @ wih.T + h @ whh.T + b
        i_g = jax.nn.sigmoid(gates[:, 0 * H:1 * H])
        f_g = jax.nn.sigmoid(gates[:, 1 * H:2 * H])
        g_g = jnp.tanh(gates[:, 2 * H:3 * H])
        o_g = jax.nn.sigmoid(gates[:, 3 * H:4 * H])
        c = f_g * c + i_g * g_g
        h = o_g * jnp.tanh(c)
    pid = jnp.exp(h @ params["w_lin"].T + params["b_lin"])
    return pid, (h[None], c[None])


if __name__ == "__main__":
    # Small shapes consistent with the module: PID -> 3 outputs (Kp, Ki, Kd).
    B, T, I, H, O = 2, 8, 4, 32, 3

    key = jax.random.PRNGKey(0)
    pkey, xkey = jax.random.split(key)
    params = init_params(pkey, input_size=I, hidden_size=H, output_size=O)
    x = jax.random.normal(xkey, (B, T, I), jnp.float32)

    pid, (h_n, c_n) = lstm_adaptive_pid_forward(params, x)
    jax.block_until_ready((pid, h_n, c_n))

    # Sanity check against a pure-JAX reference.
    pid_ref, (h_ref, c_ref) = _reference_forward(params, x)
    assert pid.shape == (B, O) and h_n.shape == (1, B, H) and c_n.shape == (1, B, H)
    assert jnp.allclose(pid, pid_ref, atol=1e-4, rtol=1e-4)
    assert jnp.allclose(h_n, h_ref, atol=1e-5, rtol=1e-5)
    assert jnp.allclose(c_n, c_ref, atol=1e-5, rtol=1e-5)

    print("KERNEL_OK")
</pallas_src>

<mosaic_0001>
module attributes {stable_mosaic.version = 11 : i64} {
  func.func @_lstm_pid_kernel(%arg0: memref<16x4xf32, #tpu.memory_space<vmem>>, %arg1: memref<4x128xf32, #tpu.memory_space<vmem>>, %arg2: memref<32x128xf32, #tpu.memory_space<vmem>>, %arg3: memref<1x128xf32, #tpu.memory_space<vmem>>, %arg4: memref<32x3xf32, #tpu.memory_space<vmem>>, %arg5: memref<1x3xf32, #tpu.memory_space<vmem>>, %arg6: memref<2x32xf32, #tpu.memory_space<vmem>>, %arg7: memref<2x32xf32, #tpu.memory_space<vmem>>, %arg8: memref<2x3xf32, #tpu.memory_space<vmem>>, %arg9: memref<2x32xf32, #tpu.memory_space<vmem>>, %arg10: memref<2x32xf32, #tpu.memory_space<vmem>>, %arg11: memref<16x128xf32, #tpu.memory_space<vmem>>) attributes {dimension_semantics = [], scalar_prefetch = 0 : i64, scratch_operands = 1 : i64, tpu.core_type = #tpu.core_type<tc>} {
    %c0 = arith.constant 0 : index
    %c0_0 = arith.constant 0 : index
    %0 = vector.load %arg0[%c0, %c0_0] : memref<16x4xf32, #tpu.memory_space<vmem>>, vector<16x4xf32>
    %c0_1 = arith.constant 0 : index
    %c0_2 = arith.constant 0 : index
    %1 = vector.load %arg1[%c0_1, %c0_2] : memref<4x128xf32, #tpu.memory_space<vmem>>, vector<4x128xf32>
    %cst = arith.constant dense<0.000000e+00> : vector<16x128xf32>
    %2 = tpu.matmul %0, %1, %cst {dimension_numbers = #tpu.dot_dimension_numbers<[1], [0], [0], [1], [0, 0, 1, 1], [], []>} : vector<16x4xf32>, vector<4x128xf32>, vector<16x128xf32> -> vector<16x128xf32>
    %c0_3 = arith.constant 0 : index
    %c0_4 = arith.constant 0 : index
    %3 = vector.load %arg3[%c0_3, %c0_4] : memref<1x128xf32, #tpu.memory_space<vmem>>, vector<1x128xf32>
    %4 = vector.broadcast %3 : vector<1x128xf32> to vector<16x128xf32>
    %5 = arith.addf %2, %4 : vector<16x128xf32>
    %c0_5 = arith.constant 0 : index
    %c0_6 = arith.constant 0 : index
    %6 = vector.load %arg11[%c0_5, %c0_6] : memref<16x128xf32, #tpu.memory_space<vmem>>, vector<16x128xf32>
    tpu.vector_store %arg11[%c0_5, %c0_6], %5 {strides = array<i32>} : memref<16x128xf32, #tpu.memory_space<vmem>>, vector<16x128xf32>,
    %c0_7 = arith.constant 0 : index
    %c0_8 = arith.constant 0 : index
    %7 = vector.load %arg2[%c0_7, %c0_8] : memref<32x128xf32, #tpu.memory_space<vmem>>, vector<32x128xf32>
    %c0_9 = arith.constant 0 : index
    %c0_10 = arith.constant 0 : index
    %8 = vector.load %arg6[%c0_9, %c0_10] : memref<2x32xf32, #tpu.memory_space<vmem>>, vector<2x32xf32>
    %c0_11 = arith.constant 0 : index
    %c0_12 = arith.constant 0 : index
    %9 = vector.load %arg7[%c0_11, %c0_12] : memref<2x32xf32, #tpu.memory_space<vmem>>, vector<2x32xf32>
    %c0_13 = arith.constant 0 : index
    %c0_14 = arith.constant 0 : index
    %10 = vector.load %arg11[%c0_13, %c0_14] : memref<16x128xf32, #tpu.memory_space<vmem>>, vector<2x128xf32>
    %cst_15 = arith.constant dense<0.000000e+00> : vector<2x128xf32>
    %11 = tpu.matmul %8, %7, %cst_15 {dimension_numbers = #tpu.dot_dimension_numbers<[1], [0], [0], [1], [0, 0, 1, 1], [], []>} : vector<2x32xf32>, vector<32x128xf32>, vector<2x128xf32> -> vector<2x128xf32>
    %12 = arith.addf %10, %11 : vector<2x128xf32>
    %13 = arith.negf %12 : vector<2x128xf32>
    %14 = math.exp %13 : vector<2x128xf32>
    %cst_16 = arith.constant 1.000000e+00 : f32
    %15 = vector.broadcast %cst_16 : f32 to vector<2x128xf32>
    %16 = arith.addf %15, %14 : vector<2x128xf32>
    %17 = arith.divf %15, %16 : vector<2x128xf32>
    %18 = math.tanh %12 : vector<2x128xf32>
    %19 = vector.extract_strided_slice %17 {offsets = [0, 0], sizes = [2, 32], strides = [1, 1]} : vector<2x128xf32> to vector<2x32xf32>
    %c96_i32 = arith.constant 96 : i32
    %20 = tpu.dynamic_rotate %17 by %c96_i32 dim 1 : vector<2x128xf32>, i32 -> vector<2x128xf32>
    %21 = vector.extract_strided_slice %20 {offsets = [0, 0], sizes = [2, 32], strides = [1, 1]} : vector<2x128xf32> to vector<2x32xf32>
    %c64_i32 = arith.constant 64 : i32
    %22 = tpu.dynamic_rotate %18 by %c64_i32 dim 1 : vector<2x128xf32>, i32 -> vector<2x128xf32>
    %23 = vector.extract_strided_slice %22 {offsets = [0, 0], sizes = [2, 32], strides = [1, 1]} : vector<2x128xf32> to vector<2x32xf32>
    %c32_i32 = arith.constant 32 : i32
    %24 = tpu.dynamic_rotate %17 by %c32_i32 dim 1 : vector<2x128xf32>, i32 -> vector<2x128xf32>
    %25 = vector.extract_strided_slice %24 {offsets = [0, 0], sizes = [2, 32], strides = [1, 1]} : vector<2x128xf32> to vector<2x32xf32>
    %26 = arith.mulf %21, %9 : vector<2x32xf32>
    %27 = arith.mulf %19, %23 : vector<2x32xf32>
    %28 = arith.addf %26, %27 : vector<2x32xf32>
    %29 = math.tanh %28 : vector<2x32xf32>
    %30 = arith.mulf %25, %29 : vector<2x32xf32>
    %c2 = arith.constant 2 : index
    %c0_17 = arith.constant 0 : index
    %31 = vector.load %arg11[%c2, %c0_17] : memref<16x128xf32, #tpu.memory_space<vmem>>, vector<2x128xf32>
    %cst_18 = arith.constant dense<0.000000e+00> : vector<2x128xf32>
    %32 = tpu.matmul %30, %7, %cst_18 {dimension_numbers = #tpu.dot_dimension_numbers<[1], [0], [0], [1], [0, 0, 1, 1], [], []>} : vector<2x32xf32>, vector<32x128xf32>, vector<2x128xf32> -> vector<2x128xf32>
    %33 = arith.addf %31, %32 : vector<2x128xf32>
    %34 = arith.negf %33 : vector<2x128xf32>
    %35 = math.exp %34 : vector<2x128xf32>
    %cst_19 = arith.constant 1.000000e+00 : f32
    %36 = vector.broadcast %cst_19 : f32 to vector<2x128xf32>
    %37 = arith.addf %36, %35 : vector<2x128xf32>
    %38 = arith.divf %36, %37 : vector<2x128xf32>
    %39 = math.tanh %33 : vector<2x128xf32>
    %40 = vector.extract_strided_slice %38 {offsets = [0, 0], sizes = [2, 32], strides = [1, 1]} : vector<2x128xf32> to vector<2x32xf32>
    %c96_i32_20 = arith.constant 96 : i32
    %41 = tpu.dynamic_rotate %38 by %c96_i32_20 dim 1 : vector<2x128xf32>, i32 -> vector<2x128xf32>
    %42 = vector.extract_strided_slice %41 {offsets = [0, 0], sizes = [2, 32], strides = [1, 1]} : vector<2x128xf32> to vector<2x32xf32>
    %c64_i32_21 = arith.constant 64 : i32
    %43 = tpu.dynamic_rotate %39 by %c64_i32_21 dim 1 : vector<2x128xf32>, i32 -> vector<2x128xf32>
    %44 = vector.extract_strided_slice %43 {offsets = [0, 0], sizes = [2, 32], strides = [1, 1]} : vector<2x128xf32> to vector<2x32xf32>
    %c32_i32_22 = arith.constant 32 : i32
    %45 = tpu.dynamic_rotate %38 by %c32_i32_22 dim 1 : vector<2x128xf32>, i32 -> vector<2x128xf32>
    %46 = vector.extract_strided_slice %45 {offsets = [0, 0], sizes = [2, 32], strides = [1, 1]} : vector<2x128xf32> to vector<2x32xf32>
    %47 = arith.mulf %42, %28 : vector<2x32xf32>
    %48 = arith.mulf %40, %44 : vector<2x32xf32>
    %49 = arith.addf %47, %48 : vector<2x32xf32>
    %50 = math.tanh %49 : vector<2x32xf32>
    %51 = arith.mulf %46, %50 : vector<2x32xf32>
    %c4 = arith.constant 4 : index
    %c0_23 = arith.constant 0 : index
    %52 = vector.load %arg11[%c4, %c0_23] : memref<16x128xf32, #tpu.memory_space<vmem>>, vector<2x128xf32>
    %cst_24 = arith.constant dense<0.000000e+00> : vector<2x128xf32>
    %53 = tpu.matmul %51, %7, %cst_24 {dimension_numbers = #tpu.dot_dimension_numbers<[1], [0], [0], [1], [0, 0, 1, 1], [], []>} : vector<2x32xf32>, vector<32x128xf32>, vector<2x128xf32> -> vector<2x128xf32>
    %54 = arith.addf %52, %53 : vector<2x128xf32>
    %55 = arith.negf %54 : vector<2x128xf32>
    %56 = math.exp %55 : vector<2x128xf32>
    %cst_25 = arith.constant 1.000000e+00 : f32
    %57 = vector.broadcast %cst_25 : f32 to vector<2x128xf32>
    %58 = arith.addf %57, %56 : vector<2x128xf32>
    %59 = arith.divf %57, %58 : vector<2x128xf32>
    %60 = math.tanh %54 : vector<2x128xf32>
    %61 = vector.extract_strided_slice %59 {offsets = [0, 0], sizes = [2, 32], strides = [1, 1]} : vector<2x128xf32> to vector<2x32xf32>
    %c96_i32_26 = arith.constant 96 : i32
    %62 = tpu.dynamic_rotate %59 by %c96_i32_26 dim 1 : vector<2x128xf32>, i32 -> vector<2x128xf32>
    %63 = vector.extract_strided_slice %62 {offsets = [0, 0], sizes = [2, 32], strides = [1, 1]} : vector<2x128xf32> to vector<2x32xf32>
    %c64_i32_27 = arith.constant 64 : i32
    %64 = tpu.dynamic_rotate %60 by %c64_i32_27 dim 1 : vector<2x128xf32>, i32 -> vector<2x128xf32>
    %65 = vector.extract_strided_slice %64 {offsets = [0, 0], sizes = [2, 32], strides = [1, 1]} : vector<2x128xf32> to vector<2x32xf32>
    %c32_i32_28 = arith.constant 32 : i32
    %66 = tpu.dynamic_rotate %59 by %c32_i32_28 dim 1 : vector<2x128xf32>, i32 -> vector<2x128xf32>
    %67 = vector.extract_strided_slice %66 {offsets = [0, 0], sizes = [2, 32], strides = [1, 1]} : vector<2x128xf32> to vector<2x32xf32>
    %68 = arith.mulf %63, %49 : vector<2x32xf32>
    %69 = arith.mulf %61, %65 : vector<2x32xf32>
    %70 = arith.addf %68, %69 : vector<2x32xf32>
    %71 = math.tanh %70 : vector<2x32xf32>
    %72 = arith.mulf %67, %71 : vector<2x32xf32>
    %c6 = arith.constant 6 : index
    %c0_29 = arith.constant 0 : index
    %73 = vector.load %arg11[%c6, %c0_29] : memref<16x128xf32, #tpu.memory_space<vmem>>, vector<2x128xf32>
    %cst_30 = arith.constant dense<0.000000e+00> : vector<2x128xf32>
    %74 = tpu.matmul %72, %7, %cst_30 {dimension_numbers = #tpu.dot_dimension_numbers<[1], [0], [0], [1], [0, 0, 1, 1], [], []>} : vector<2x32xf32>, vector<32x128xf32>, vector<2x128xf32> -> vector<2x128xf32>
    %75 = arith.addf %73, %74 : vector<2x128xf32>
    %76 = arith.negf %75 : vector<2x128xf32>
    %77 = math.exp %76 : vector<2x128xf32>
    %cst_31 = arith.constant 1.000000e+00 : f32
    %78 = vector.broadcast %cst_31 : f32 to vector<2x128xf32>
    %79 = arith.addf %78, %77 : vector<2x128xf32>
    %80 = arith.divf %78, %79 : vector<2x128xf32>
    %81 = math.tanh %75 : vector<2x128xf32>
    %82 = vector.extract_strided_slice %80 {offsets = [0, 0], sizes = [2, 32], strides = [1, 1]} : vector<2x128xf32> to vector<2x32xf32>
    %c96_i32_32 = arith.constant 96 : i32
    %83 = tpu.dynamic_rotate %80 by %c96_i32_32 dim 1 : vector<2x128xf32>, i32 -> vector<2x128xf32>
    %84 = vector.extract_strided_slice %83 {offsets = [0, 0], sizes = [2, 32], strides = [1, 1]} : vector<2x128xf32> to vector<2x32xf32>
    %c64_i32_33 = arith.constant 64 : i32
    %85 = tpu.dynamic_rotate %81 by %c64_i32_33 dim 1 : vector<2x128xf32>, i32 -> vector<2x128xf32>
    %86 = vector.extract_strided_slice %85 {offsets = [0, 0], sizes = [2, 32], strides = [1, 1]} : vector<2x128xf32> to vector<2x32xf32>
    %c32_i32_34 = arith.constant 32 : i32
    %87 = tpu.dynamic_rotate %80 by %c32_i32_34 dim 1 : vector<2x128xf32>, i32 -> vector<2x128xf32>
    %88 = vector.extract_strided_slice %87 {offsets = [0, 0], sizes = [2, 32], strides = [1, 1]} : vector<2x128xf32> to vector<2x32xf32>
    %89 = arith.mulf %84, %70 : vector<2x32xf32>
    %90 = arith.mulf %82, %86 : vector<2x32xf32>
    %91 = arith.addf %89, %90 : vector<2x32xf32>
    %92 = math.tanh %91 : vector<2x32xf32>
    %93 = arith.mulf %88, %92 : vector<2x32xf32>
    %c8 = arith.constant 8 : index
    %c0_35 = arith.constant 0 : index
    %94 = vector.load %arg11[%c8, %c0_35] : memref<16x128xf32, #tpu.memory_space<vmem>>, vector<2x128xf32>
    %cst_36 = arith.constant dense<0.000000e+00> : vector<2x128xf32>
    %95 = tpu.matmul %93, %7, %cst_36 {dimension_numbers = #tpu.dot_dimension_numbers<[1], [0], [0], [1], [0, 0, 1, 1], [], []>} : vector<2x32xf32>, vector<32x128xf32>, vector<2x128xf32> -> vector<2x128xf32>
    %96 = arith.addf %94, %95 : vector<2x128xf32>
    %97 = arith.negf %96 : vector<2x128xf32>
    %98 = math.exp %97 : vector<2x128xf32>
    %cst_37 = arith.constant 1.000000e+00 : f32
    %99 = vector.broadcast %cst_37 : f32 to vector<2x128xf32>
    %100 = arith.addf %99, %98 : vector<2x128xf32>
    %101 = arith.divf %99, %100 : vector<2x128xf32>
    %102 = math.tanh %96 : vector<2x128xf32>
    %103 = vector.extract_strided_slice %101 {offsets = [0, 0], sizes = [2, 32], strides = [1, 1]} : vector<2x128xf32> to vector<2x32xf32>
    %c96_i32_38 = arith.constant 96 : i32
    %104 = tpu.dynamic_rotate %101 by %c96_i32_38 dim 1 : vector<2x128xf32>, i32 -> vector<2x128xf32>
    %105 = vector.extract_strided_slice %104 {offsets = [0, 0], sizes = [2, 32], strides = [1, 1]} : vector<2x128xf32> to vector<2x32xf32>
    %c64_i32_39 = arith.constant 64 : i32
    %106 = tpu.dynamic_rotate %102 by %c64_i32_39 dim 1 : vector<2x128xf32>, i32 -> vector<2x128xf32>
    %107 = vector.extract_strided_slice %106 {offsets = [0, 0], sizes = [2, 32], strides = [1, 1]} : vector<2x128xf32> to vector<2x32xf32>
    %c32_i32_40 = arith.constant 32 : i32
    %108 = tpu.dynamic_rotate %101 by %c32_i32_40 dim 1 : vector<2x128xf32>, i32 -> vector<2x128xf32>
    %109 = vector.extract_strided_slice %108 {offsets = [0, 0], sizes = [2, 32], strides = [1, 1]} : vector<2x128xf32> to vector<2x32xf32>
    %110 = arith.mulf %105, %91 : vector<2x32xf32>
    %111 = arith.mulf %103, %107 : vector<2x32xf32>
    %112 = arith.addf %110, %111 : vector<2x32xf32>
    %113 = math.tanh %112 : vector<2x32xf32>
    %114 = arith.mulf %109, %113 : vector<2x32xf32>
    %c10 = arith.constant 10 : index
    %c0_41 = arith.constant 0 : index
    %115 = vector.load %arg11[%c10, %c0_41] : memref<16x128xf32, #tpu.memory_space<vmem>>, vector<2x128xf32>
    %cst_42 = arith.constant dense<0.000000e+00> : vector<2x128xf32>
    %116 = tpu.matmul %114, %7, %cst_42 {dimension_numbers = #tpu.dot_dimension_numbers<[1], [0], [0], [1], [0, 0, 1, 1], [], []>} : vector<2x32xf32>, vector<32x128xf32>, vector<2x128xf32> -> vector<2x128xf32>
    %117 = arith.addf %115, %116 : vector<2x128xf32>
    %118 = arith.negf %117 : vector<2x128xf32>
    %119 = math.exp %118 : vector<2x128xf32>
    %cst_43 = arith.constant 1.000000e+00 : f32
    %120 = vector.broadcast %cst_43 : f32 to vector<2x128xf32>
    %121 = arith.addf %120, %119 : vector<2x128xf32>
    %122 = arith.divf %120, %121 : vector<2x128xf32>
    %123 = math.tanh %117 : vector<2x128xf32>
    %124 = vector.extract_strided_slice %122 {offsets = [0, 0], sizes = [2, 32], strides = [1, 1]} : vector<2x128xf32> to vector<2x32xf32>
    %c96_i32_44 = arith.constant 96 : i32
    %125 = tpu.dynamic_rotate %122 by %c96_i32_44 dim 1 : vector<2x128xf32>, i32 -> vector<2x128xf32>
    %126 = vector.extract_strided_slice %125 {offsets = [0, 0], sizes = [2, 32], strides = [1, 1]} : vector<2x128xf32> to vector<2x32xf32>
    %c64_i32_45 = arith.constant 64 : i32
    %127 = tpu.dynamic_rotate %123 by %c64_i32_45 dim 1 : vector<2x128xf32>, i32 -> vector<2x128xf32>
    %128 = vector.extract_strided_slice %127 {offsets = [0, 0], sizes = [2, 32], strides = [1, 1]} : vector<2x128xf32> to vector<2x32xf32>
    %c32_i32_46 = arith.constant 32 : i32
    %129 = tpu.dynamic_rotate %122 by %c32_i32_46 dim 1 : vector<2x128xf32>, i32 -> vector<2x128xf32>
    %130 = vector.extract_strided_slice %129 {offsets = [0, 0], sizes = [2, 32], strides = [1, 1]} : vector<2x128xf32> to vector<2x32xf32>
    %131 = arith.mulf %126, %112 : vector<2x32xf32>
    %132 = arith.mulf %124, %128 : vector<2x32xf32>
    %133 = arith.addf %131, %132 : vector<2x32xf32>
    %134 = math.tanh %133 : vector<2x32xf32>
    %135 = arith.mulf %130, %134 : vector<2x32xf32>
    %c12 = arith.constant 12 : index
    %c0_47 = arith.constant 0 : index
    %136 = vector.load %arg11[%c12, %c0_47] : memref<16x128xf32, #tpu.memory_space<vmem>>, vector<2x128xf32>
    %cst_48 = arith.constant dense<0.000000e+00> : vector<2x128xf32>
    %137 = tpu.matmul %135, %7, %cst_48 {dimension_numbers = #tpu.dot_dimension_numbers<[1], [0], [0], [1], [0, 0, 1, 1], [], []>} : vector<2x32xf32>, vector<32x128xf32>, vector<2x128xf32> -> vector<2x128xf32>
    %138 = arith.addf %136, %137 : vector<2x128xf32>
    %139 = arith.negf %138 : vector<2x128xf32>
    %140 = math.exp %139 : vector<2x128xf32>
    %cst_49 = arith.constant 1.000000e+00 : f32
    %141 = vector.broadcast %cst_49 : f32 to vector<2x128xf32>
    %142 = arith.addf %141, %140 : vector<2x128xf32>
    %143 = arith.divf %141, %142 : vector<2x128xf32>
    %144 = math.tanh %138 : vector<2x128xf32>
    %145 = vector.extract_strided_slice %143 {offsets = [0, 0], sizes = [2, 32], strides = [1, 1]} : vector<2x128xf32> to vector<2x32xf32>
    %c96_i32_50 = arith.constant 96 : i32
    %146 = tpu.dynamic_rotate %143 by %c96_i32_50 dim 1 : vector<2x128xf32>, i32 -> vector<2x128xf32>
    %147 = vector.extract_strided_slice %146 {offsets = [0, 0], sizes = [2, 32], strides = [1, 1]} : vector<2x128xf32> to vector<2x32xf32>
    %c64_i32_51 = arith.constant 64 : i32
    %148 = tpu.dynamic_rotate %144 by %c64_i32_51 dim 1 : vector<2x128xf32>, i32 -> vector<2x128xf32>
    %149 = vector.extract_strided_slice %148 {offsets = [0, 0], sizes = [2, 32], strides = [1, 1]} : vector<2x128xf32> to vector<2x32xf32>
    %c32_i32_52 = arith.constant 32 : i32
    %150 = tpu.dynamic_rotate %143 by %c32_i32_52 dim 1 : vector<2x128xf32>, i32 -> vector<2x128xf32>
    %151 = vector.extract_strided_slice %150 {offsets = [0, 0], sizes = [2, 32], strides = [1, 1]} : vector<2x128xf32> to vector<2x32xf32>
    %152 = arith.mulf %147, %133 : vector<2x32xf32>
    %153 = arith.mulf %145, %149 : vector<2x32xf32>
    %154 = arith.addf %152, %153 : vector<2x32xf32>
    %155 = math.tanh %154 : vector<2x32xf32>
    %156 = arith.mulf %151, %155 : vector<2x32xf32>
    %c14 = arith.constant 14 : index
    %c0_53 = arith.constant 0 : index
    %157 = vector.load %arg11[%c14, %c0_53] : memref<16x128xf32, #tpu.memory_space<vmem>>, vector<2x128xf32>
    %cst_54 = arith.constant dense<0.000000e+00> : vector<2x128xf32>
    %158 = tpu.matmul %156, %7, %cst_54 {dimension_numbers = #tpu.dot_dimension_numbers<[1], [0], [0], [1], [0, 0, 1, 1], [], []>} : vector<2x32xf32>, vector<32x128xf32>, vector<2x128xf32> -> vector<2x128xf32>
    %159 = arith.addf %157, %158 : vector<2x128xf32>
    %160 = arith.negf %159 : vector<2x128xf32>
    %161 = math.exp %160 : vector<2x128xf32>
    %cst_55 = arith.constant 1.000000e+00 : f32
    %162 = vector.broadcast %cst_55 : f32 to vector<2x128xf32>
    %163 = arith.addf %162, %161 : vector<2x128xf32>
    %164 = arith.divf %162, %163 : vector<2x128xf32>
    %165 = math.tanh %159 : vector<2x128xf32>
    %166 = vector.extract_strided_slice %164 {offsets = [0, 0], sizes = [2, 32], strides = [1, 1]} : vector<2x128xf32> to vector<2x32xf32>
    %c96_i32_56 = arith.constant 96 : i32
    %167 = tpu.dynamic_rotate %164 by %c96_i32_56 dim 1 : vector<2x128xf32>, i32 -> vector<2x128xf32>
    %168 = vector.extract_strided_slice %167 {offsets = [0, 0], sizes = [2, 32], strides = [1, 1]} : vector<2x128xf32> to vector<2x32xf32>
    %c64_i32_57 = arith.constant 64 : i32
    %169 = tpu.dynamic_rotate %165 by %c64_i32_57 dim 1 : vector<2x128xf32>, i32 -> vector<2x128xf32>
    %170 = vector.extract_strided_slice %169 {offsets = [0, 0], sizes = [2, 32], strides = [1, 1]} : vector<2x128xf32> to vector<2x32xf32>
    %c32_i32_58 = arith.constant 32 : i32
    %171 = tpu.dynamic_rotate %164 by %c32_i32_58 dim 1 : vector<2x128xf32>, i32 -> vector<2x128xf32>
    %172 = vector.extract_strided_slice %171 {offsets = [0, 0], sizes = [2, 32], strides = [1, 1]} : vector<2x128xf32> to vector<2x32xf32>
    %173 = arith.mulf %168, %154 : vector<2x32xf32>
    %174 = arith.mulf %166, %170 : vector<2x32xf32>
    %175 = arith.addf %173, %174 : vector<2x32xf32>
    %176 = math.tanh %175 : vector<2x32xf32>
    %177 = arith.mulf %172, %176 : vector<2x32xf32>
    %c0_59 = arith.constant 0 : index
    %c0_60 = arith.constant 0 : index
    %178 = vector.load %arg4[%c0_59, %c0_60] : memref<32x3xf32, #tpu.memory_space<vmem>>, vector<32x3xf32>
    %cst_61 = arith.constant dense<0.000000e+00> : vector<2x3xf32>
    %179 = tpu.matmul %177, %178, %cst_61 {dimension_numbers = #tpu.dot_dimension_numbers<[1], [0], [0], [1], [0, 0, 1, 1], [], []>} : vector<2x32xf32>, vector<32x3xf32>, vector<2x3xf32> -> vector<2x3xf32>
    %c0_62 = arith.constant 0 : index
    %c0_63 = arith.constant 0 : index
    %180 = vector.load %arg5[%c0_62, %c0_63] : memref<1x3xf32, #tpu.memory_space<vmem>>, vector<1x3xf32>
    %181 = vector.broadcast %180 : vector<1x3xf32> to vector<2x3xf32>
    %182 = arith.addf %179, %181 : vector<2x3xf32>
    %183 = math.exp %182 : vector<2x3xf32>
    %c0_64 = arith.constant 0 : index
    %c0_65 = arith.constant 0 : index
    %184 = vector.load %arg8[%c0_64, %c0_65] : memref<2x3xf32, #tpu.memory_space<vmem>>, vector<2x3xf32>
    tpu.vector_store %arg8[%c0_64, %c0_65], %183 {strides = array<i32>} : memref<2x3xf32, #tpu.memory_space<vmem>>, vector<2x3xf32>,
    %c0_66 = arith.constant 0 : index
    %c0_67 = arith.constant 0 : index
    %185 = vector.load %arg9[%c0_66, %c0_67] : memref<2x32xf32, #tpu.memory_space<vmem>>, vector<2x32xf32>
    tpu.vector_store %arg9[%c0_66, %c0_67], %177 {strides = array<i32>} : memref<2x32xf32, #tpu.memory_space<vmem>>, vector<2x32xf32>,
    %c0_68 = arith.constant 0 : index
    %c0_69 = arith.constant 0 : index
    %186 = vector.load %arg10[%c0_68, %c0_69] : memref<2x32xf32, #tpu.memory_space<vmem>>, vector<2x32xf32>
    tpu.vector_store %arg10[%c0_68, %c0_69], %175 {strides = array<i32>} : memref<2x32xf32, #tpu.memory_space<vmem>>, vector<2x32xf32>,
    return
  }
}

</mosaic_0001>

<bundles_post_ra>
// kernel: tpu_custom_call.1
= control target key start
LH: loop header
LB: loop body
LE: loop exit
PB: predicated region body
PF: predicated region fallthrough
CT: control target
= control target key end

     0   :  { %16 = vsyncpa [#allocation4], 0  ;;  %vm51_vm0 = vcmask 1043456   ;;  %vm44_vm1 = vcmask 31744   ;;  %v1327_v4 = vmov 0.0   ;;  %s1571_s0 = inlined_call_operand.vmem [shape: f32[16,4], index: 0, kind: input, shape index: {}]   ;;  %s1572_s1 = inlined_call_operand.vmem [shape: f32[4,128], index: 1, kind: input, shape index: {}]   ;;  %s1573_s2 = inlined_call_operand.vmem [shape: f32[32,128], index: 2, kind: input, shape index: {}]   ;;  %s1574_s3 = inlined_call_operand.vmem [shape: f32[1,128], index: 3, kind: input, shape index: {}]   ;;  %s1575_s4 = inlined_call_operand.vmem [shape: f32[32,3], index: 4, kind: input, shape index: {}]   ;;  %s1576_s5 = inlined_call_operand.vmem [shape: f32[1,3], index: 5, kind: input, shape index: {}]   ;;  %s1577_s6 = inlined_call_operand.vmem [shape: f32[2,32], index: 6, kind: input, shape index: {}]   ;;  %s1578_s7 = inlined_call_operand.vmem [shape: f32[2,32], index: 7, kind: input, shape index: {}]   ;;  %s1579_s8 = inlined_call_operand.hbm [shape: f32[2,3], index: 8, kind: output, shape index: {0}]   ;;  %s1580_s9 = inlined_call_operand.hbm [shape: f32[2,32], index: 9, kind: output, shape index: {1}]   ;;  %s1581_s10 = inlined_call_operand.hbm [shape: f32[2,32], index: 10, kind: output, shape index: {2}]  }
   0x1   :  { %v36_v0 = vld [vmem:[%s1572_s1] sm:$0xf]  ;;  %v35_v2 = vld [vmem:[%s1571_s0 + $0x8] sm:$0xff]  ;;  %v1402_v3 = vld [vmem:[%s1573_s2 + $0x18] sm:$0xff]  ;;  %1090 = vmatprep.subr.mxu1 %v1327_v4 }
   0x2   :  { %v34_v1 = vld [vmem:[%s1571_s0] sm:$0xff]  ;;  %1085 = vmatprep.subr.msk.mxu0 %vm51_vm0, %v36_v0  ;;  %v1408_v5 = vld [vmem:[%s1573_s2 + $0x10] sm:$0xff] }
   0x3   :  { %1087 = vmatprep.mubr.msk.f32.mxu0 %vm44_vm1, %v34_v1  ;;  %1086 = vmatpush3.msk.msra.mxu0 %vm51_vm0, %v36_v0 }
   0x4   :  { %17 = vsyncpa [#allocation6], 0  ;;  %1088 = vmatmul.mubr.msk.f32.vlgmr.msra.gmra.mxu0 %vm44_vm1, %v35_v2  ;;  %1091 = vmatpush3.msra.mxu1 %v1402_v3  ;;  %v1415_v6 = vld [vmem:[%s1573_s2 + $0x8] sm:$0xff]  ;;  %vm1328_vm2 = vmmov 0   ;;  %v1425_v7 = vld [vmem:[%s1573_s2] sm:$0xff]  ;;  %vm139_vm3 = vcmask 261120  }
   0x5   :  { %1092 = vmatprep.subr.mxu1 %v1327_v4  ;;  %1098 = vmatprep.mubr.msk.f32.mxu1 %vm1328_vm2, %v1327_v4  ;;  %v136_v8 = vld [vmem:[%s1577_s6] sm:$0x3]  ;;  %s1329_s27 = smov 32   ;;  %s1331_s28 = smov 64   ;;  %vm971_vm4 = vcmask 254976  }
   0x6   :  { %1093 = vmatpush3.msra.mxu1 %v1408_v5  ;;  %1101 = vmatprep.subr.mxu0 %v1327_v4  ;;  %v1015_v9 = vld [vmem:[%s1574_s3] ss:$0 sm:$0xff]  ;;  %s1330_s3 = smov 96   ;;  %s1332_s18 = smov [#allocation5]  }
   0x7   :  { %1094 = vmatprep.subr.mxu1 %v1327_v4  ;;  %1102 = vmatpush3.msra.mxu0 %v1402_v3  ;;  %v137_v24 = vld [vmem:[%s1578_s7] sm:$0x3]  ;;  %s990_s19 = sshll.u32 %s1332_s18, 4  ;;  %s991_s19 = int_to_ptr.vmem [resolvable:$true] %s990_s19 }
   0x8   :  { %1095 = vmatpush3.msra.mxu1 %v1415_v6  ;;  %1103 = vmatprep.subr.mxu0 %v1327_v4  ;;  %p1268_p1 = scmp.lt.s32.totalorder %s991_s19, %s991_s19 }
   0x9   :  { %1096 = vmatprep.subr.mxu1 %v1327_v4  ;;  %1104 = vmatpush3.msra.mxu0 %v1408_v5 }
   0xa   :  { %1097 = vmatpush3.msra.mxu1 %v1425_v7  ;;  %1105 = vmatprep.subr.mxu0 %v1327_v4 }
   0xb   :  { %1099 = vmatmul.mubr.msk.f32.vlgmr.msra.gmra.mxu1 %vm139_vm3, %v136_v8  ;;  %1106 = vmatpush3.msra.mxu0 %v1415_v6 }
   0xc   :  { %1107 = vmatprep.subr.mxu0 %v1327_v4  ;;  %1109 = vmatprep.mubr.msk.f32.mxu0 %vm1328_vm2, %v1327_v4 }
   0xd   :  { %1108 = vmatpush3.msra.mxu0 %v1425_v7  ;;  %1112 = vmatprep.subr.mxu1 %v1327_v4 }
   0xe   :  { %1113 = vmatpush3.msra.mxu1 %v1402_v3  ;;  %1120 = vmatprep.mubr.msk.f32.mxu1 %vm1328_vm2, %v1327_v4 }
   0xf   :  { %1114 = vmatprep.subr.mxu1 %v1327_v4  ;;  %1123 = vmatprep.subr.mxu0 %v1327_v4 }
  0x10   :  { %1115 = vmatpush3.msra.mxu1 %v1408_v5 }
  0x11   :  { %1116 = vmatprep.subr.mxu1 %v1327_v4 }
  0x12   :  { %1117 = vmatpush3.msra.mxu1 %v1415_v6 }
  0x13   :  { %1118 = vmatprep.subr.mxu1 %v1327_v4 }
  0x14   :  { %1119 = vmatpush3.msra.mxu1 %v1425_v7 }
  0x15   :  { %1134 = vmatprep.subr.mxu1 %v1327_v4 }
  0xc4   :  { %v1089_v10 = vpop.f32.mrf.mxu0 }
  0xc5   :  { %v127_v11 = vadd.f32 %v1089_v10, %v1015_v9 }
  0xc6   :  { %v121_v12 = vpop.f32.mrf.mxu0 }
  0xc7   :  { %131 = vst [vmem:[#allocation2 + $0x8] sm:$0xff] %v127_v11  ;;  %v122_v13 = vadd.f32 %v1015_v9, %v121_v12 }
  0xc9   :  { %130 = vst [vmem:[#allocation2] sm:$0xff] %v122_v13 }
  0xcb   :  { %v209_v14 = vpop.f32.mrf.mxu1 }
  0xcd   :  { %v1100_v15 = vpop.f32.mrf.mxu1 }
  0xd0   :  { %v138_v16 = vld [vmem:[#allocation2] sm:$0x3]  ;;  %v232_v32 = vld [vmem:[#allocation2 + $0x2] sm:$0x3]  ;;  %v325_v49 = vld [vmem:[#allocation2 + $0x4] sm:$0x3] }
  0xd1   :  { %v213_v17 = vadd.f32 %v209_v14, %v138_v16  ;;  %v418_v2 = vld [vmem:[#allocation2 + $0x6] sm:$0x3] }
  0xd3   :  { %v1020_v18 = vmul.f32 -1.442695, %v213_v17 }
  0xd5   :  { %1197 = vpow2.f32 %v1020_v18 }
  0xe2   :  { %v1198_v19 = vpop.eup %1197 }
  0xe3   :  { %v217_v20 = vadd.f32 1.0, %v1198_v19 }
  0xe5   :  { %1199 = vrcp.f32 %v217_v20 }
  0xe6   :  { %1201 = vtanh.f32 %v213_v17 }
  0xf2   :  { %v1200_v21 = vpop.eup %1199 }
  0xf3   :  { %225 = vrot.lane.b32.xlu1 %v1200_v21, %s1329_s27  ;;  %221 = vrot.lane.b32.xlu0 %v1200_v21, %s1330_s3  ;;  %v1202_v22 = vpop.eup %1201 }
  0xf7   :  { %223 = vrot.lane.b32.xlu0 %v1202_v22, %s1331_s28 }
 0x165   :  { %v222_v23 = vpop.permute.xlu0 %221  ;;  %v226_v30 = vpop.permute.xlu1 %225 }
 0x166   :  { %v227_v26 = vmul.f32 %v222_v23, %v137_v24  ;;  %v511_v24 = vld [vmem:[#allocation2 + $0x8] sm:$0x3] }
 0x169   :  { %v224_v25 = vpop.permute.xlu0 %223 }
 0x16a   :  { %v228_v27 = vmul.f32 %v1200_v21, %v224_v25 }
 0x16c   :  { %v229_v28 = vadd.f32 %v228_v27, %v227_v26 }
 0x16e   :  { %1203 = vtanh.f32 %v229_v28 }
 0x17b   :  { %v1204_v29 = vpop.eup %1203 }
 0x17c   :  { %v231_v31 = vmul.f32 %v1204_v29, %v226_v30 }
 0x17e   :  { %1110 = vmatmul.mubr.msk.f32.vlgmr.msra.gmra.mxu0 %vm139_vm3, %v231_v31 }
 0x17f   :  { %1124 = vmatpush3.msra.mxu0 %v1402_v3  ;;  %1131 = vmatprep.mubr.msk.f32.mxu0 %vm1328_vm2, %v1327_v4 }
 0x180   :  { %1125 = vmatprep.subr.mxu0 %v1327_v4 }
 0x181   :  { %1126 = vmatpush3.msra.mxu0 %v1408_v5 }
 0x182   :  { %1127 = vmatprep.subr.mxu0 %v1327_v4 }
 0x183   :  { %1128 = vmatpush3.msra.mxu0 %v1415_v6 }
 0x184   :  { %1129 = vmatprep.subr.mxu0 %v1327_v4 }
 0x185   :  { %1130 = vmatpush3.msra.mxu0 %v1425_v7 }
 0x186   :  { %1145 = vmatprep.subr.mxu0 %v1327_v4 }
 0x23e   :  { %v302_v33 = vpop.f32.mrf.mxu0 }
 0x23f   :  { %v306_v34 = vadd.f32 %v302_v33, %v232_v32 }
 0x240   :  { %v1111_v35 = vpop.f32.mrf.mxu0 }
 0x241   :  { %v1022_v36 = vmul.f32 -1.442695, %v306_v34  ;;  %1205 = vtanh.f32 %v306_v34 }
 0x243   :  { %1207 = vpow2.f32 %v1022_v36 }
 0x24e   :  { %v1206_v37 = vpop.eup %1205 }
 0x24f   :  { %316 = vrot.lane.b32.xlu0 %v1206_v37, %s1331_s28 }
 0x250   :  { %v1208_v38 = vpop.eup %1207 }
 0x251   :  { %v310_v39 = vadd.f32 1.0, %v1208_v38 }
 0x253   :  { %1209 = vrcp.f32 %v310_v39 }
 0x260   :  { %v1210_v40 = vpop.eup %1209 }
 0x261   :  { %314 = vrot.lane.b32.xlu1 %v1210_v40, %s1330_s3 }
 0x265   :  { %318 = vrot.lane.b32.xlu1 %v1210_v40, %s1329_s27 }
 0x2c1   :  { %v317_v41 = vpop.permute.xlu0 %316 }
 0x2c2   :  { %v321_v43 = vmul.f32 %v1210_v40, %v317_v41  ;;  %v604_v41 = vld [vmem:[#allocation2 + $0xa] sm:$0x3] }
 0x2d3   :  { %v315_v42 = vpop.permute.xlu1 %314 }
 0x2d4   :  { %v320_v44 = vmul.f32 %v315_v42, %v229_v28 }
 0x2d6   :  { %v322_v45 = vadd.f32 %v321_v43, %v320_v44 }
 0x2d7   :  { %v319_v47 = vpop.permute.xlu1 %318 }
 0x2d8   :  { %1211 = vtanh.f32 %v322_v45 }
 0x2e5   :  { %v1212_v46 = vpop.eup %1211 }
 0x2e6   :  { %v324_v48 = vmul.f32 %v1212_v46, %v319_v47 }
 0x2e8   :  { %1121 = vmatmul.mubr.msk.f32.vlgmr.msra.gmra.mxu1 %vm139_vm3, %v324_v48 }
 0x2e9   :  { %1135 = vmatpush3.msra.mxu1 %v1402_v3  ;;  %1142 = vmatprep.mubr.msk.f32.mxu1 %vm1328_vm2, %v1327_v4 }
 0x2ea   :  { %1136 = vmatprep.subr.mxu1 %v1327_v4 }
 0x2eb   :  { %1137 = vmatpush3.msra.mxu1 %v1408_v5 }
 0x2ec   :  { %1138 = vmatprep.subr.mxu1 %v1327_v4 }
 0x2ed   :  { %1139 = vmatpush3.msra.mxu1 %v1415_v6 }
 0x2ee   :  { %1140 = vmatprep.subr.mxu1 %v1327_v4 }
 0x2ef   :  { %1141 = vmatpush3.msra.mxu1 %v1425_v7 }
 0x2f0   :  { %1156 = vmatprep.subr.mxu1 %v1327_v4 }
 0x3a8   :  { %v395_v50 = vpop.f32.mrf.mxu1 }
 0x3a9   :  { %v399_v51 = vadd.f32 %v395_v50, %v325_v49 }
 0x3aa   :  { %v1122_v52 = vpop.f32.mrf.mxu1 }
 0x3ab   :  { %v1024_v53 = vmul.f32 -1.442695, %v399_v51  ;;  %1213 = vtanh.f32 %v399_v51 }
 0x3ad   :  { %1215 = vpow2.f32 %v1024_v53 }
 0x3b8   :  { %v1214_v54 = vpop.eup %1213 }
 0x3b9   :  { %409 = vrot.lane.b32.xlu1 %v1214_v54, %s1331_s28  ;;  %v697_v54 = vld [vmem:[#allocation2 + $0xc] sm:$0x3] }
 0x3ba   :  { %v1216_v55 = vpop.eup %1215 }
 0x3bb   :  { %v403_v56 = vadd.f32 1.0, %v1216_v55 }
 0x3bd   :  { %1217 = vrcp.f32 %v403_v56 }
 0x3ca   :  { %v1218_v57 = vpop.eup %1217 }
 0x3cb   :  { %407 = vrot.lane.b32.xlu0 %v1218_v57, %s1330_s3 }
 0x3cf   :  { %411 = vrot.lane.b32.xlu0 %v1218_v57, %s1329_s27 }
 0x42b   :  { %v410_v58 = vpop.permute.xlu1 %409 }
 0x42c   :  { %v414_v60 = vmul.f32 %v1218_v57, %v410_v58 }
 0x43d   :  { %v408_v59 = vpop.permute.xlu0 %407 }
 0x43e   :  { %v413_v61 = vmul.f32 %v408_v59, %v322_v45 }
 0x440   :  { %v415_v62 = vadd.f32 %v414_v60, %v413_v61 }
 0x441   :  { %v412_v0 = vpop.permute.xlu0 %411 }
 0x442   :  { %1219 = vtanh.f32 %v415_v62 }
 0x44f   :  { %v1220_v63 = vpop.eup %1219 }
 0x450   :  { %v417_v1 = vmul.f32 %v1220_v63, %v412_v0 }
 0x452   :  { %1132 = vmatmul.mubr.msk.f32.vlgmr.msra.gmra.mxu0 %vm139_vm3, %v417_v1 }
 0x453   :  { %1146 = vmatpush3.msra.mxu0 %v1402_v3  ;;  %1153 = vmatprep.mubr.msk.f32.mxu0 %vm1328_vm2, %v1327_v4 }
 0x454   :  { %1147 = vmatprep.subr.mxu0 %v1327_v4 }
 0x455   :  { %1148 = vmatpush3.msra.mxu0 %v1408_v5 }
 0x456   :  { %1149 = vmatprep.subr.mxu0 %v1327_v4 }
 0x457   :  { %1150 = vmatpush3.msra.mxu0 %v1415_v6 }
 0x458   :  { %1151 = vmatprep.subr.mxu0 %v1327_v4 }
 0x459   :  { %1152 = vmatpush3.msra.mxu0 %v1425_v7 }
 0x45a   :  { %1167 = vmatprep.subr.mxu0 %v1327_v4 }
 0x512   :  { %v488_v8 = vpop.f32.mrf.mxu0 }
 0x513   :  { %v492_v9 = vadd.f32 %v488_v8, %v418_v2 }
 0x514   :  { %v1133_v10 = vpop.f32.mrf.mxu0 }
 0x515   :  { %v1026_v11 = vmul.f32 -1.442695, %v492_v9  ;;  %1221 = vtanh.f32 %v492_v9 }
 0x517   :  { %1223 = vpow2.f32 %v1026_v11 }
 0x522   :  { %v1222_v12 = vpop.eup %1221 }
 0x523   :  { %502 = vrot.lane.b32.xlu0 %v1222_v12, %s1331_s28  ;;  %v790_v12 = vld [vmem:[#allocation2 + $0xe] sm:$0x3] }
 0x524   :  { %v1224_v13 = vpop.eup %1223 }
 0x525   :  { %v496_v14 = vadd.f32 1.0, %v1224_v13 }
 0x527   :  { %1225 = vrcp.f32 %v496_v14 }
 0x534   :  { %v1226_v15 = vpop.eup %1225 }
 0x535   :  { %500 = vrot.lane.b32.xlu1 %v1226_v15, %s1330_s3 }
 0x539   :  { %504 = vrot.lane.b32.xlu1 %v1226_v15, %s1329_s27 }
 0x595   :  { %v503_v16 = vpop.permute.xlu0 %502 }
 0x596   :  { %v507_v18 = vmul.f32 %v1226_v15, %v503_v16 }
 0x5a7   :  { %v501_v17 = vpop.permute.xlu1 %500 }
 0x5a8   :  { %v506_v19 = vmul.f32 %v501_v17, %v415_v62 }
 0x5aa   :  { %v508_v20 = vadd.f32 %v507_v18, %v506_v19 }
 0x5ab   :  { %v505_v22 = vpop.permute.xlu1 %504 }
 0x5ac   :  { %1227 = vtanh.f32 %v508_v20 }
 0x5b9   :  { %v1228_v21 = vpop.eup %1227 }
 0x5ba   :  { %v510_v23 = vmul.f32 %v1228_v21, %v505_v22  ;;  %v886_v21 = vld [vmem:[%s1575_s4 + $0x18] sm:$0xff]  ;;  %v885_v22 = vld [vmem:[%s1575_s4 + $0x10] sm:$0xff] }
 0x5bc   :  { %1143 = vmatmul.mubr.msk.f32.vlgmr.msra.gmra.mxu1 %vm139_vm3, %v510_v23  ;;  %v884_v23 = vld [vmem:[%s1575_s4 + $0x8] sm:$0xff] }
 0x5bd   :  { %1157 = vmatpush3.msra.mxu1 %v1402_v3  ;;  %1164 = vmatprep.mubr.msk.f32.mxu1 %vm1328_vm2, %v1327_v4 }
 0x5be   :  { %1158 = vmatprep.subr.mxu1 %v1327_v4 }
 0x5bf   :  { %1159 = vmatpush3.msra.mxu1 %v1408_v5 }
 0x5c0   :  { %1160 = vmatprep.subr.mxu1 %v1327_v4 }
 0x5c1   :  { %1161 = vmatpush3.msra.mxu1 %v1415_v6 }
 0x5c2   :  { %1162 = vmatprep.subr.mxu1 %v1327_v4 }
 0x5c3   :  { %1163 = vmatpush3.msra.mxu1 %v1425_v7 }
 0x5c4   :  { %1178 = vmatprep.subr.mxu1 %v1327_v4 }
 0x67c   :  { %v581_v25 = vpop.f32.mrf.mxu1 }
 0x67d   :  { %v585_v26 = vadd.f32 %v581_v25, %v511_v24  ;;  %v883_v24 = vld [vmem:[%s1575_s4] sm:$0xff]  ;;  %s1263_s4 = scalar_lea.vmem %s991_s19, 32 }
 0x67e   :  { %v1144_v27 = vpop.f32.mrf.mxu1  ;;  %p1264_p0 = scmp.ne.s32.totalorder %s991_s19, %s1263_s4  ;;  %p1269_p2 = scmp.lt.s32.totalorder %s1263_s4, %s1263_s4 }
 0x67f   :  { %v1028_v28 = vmul.f32 -1.442695, %v585_v26  ;;  %1229 = vtanh.f32 %v585_v26 }
 0x680   :  { %p1270_p3 = por %p1269_p2, %p1268_p1 }
 0x681   :  { %1231 = vpow2.f32 %v1028_v28 }
 0x682   :  { %p1271_p4 = pnand %p1270_p3, %p1264_p0 }
 0x68c   :  { %v1230_v29 = vpop.eup %1229 }
 0x68d   :  { %595 = vrot.lane.b32.xlu1 %v1230_v29, %s1331_s28 }
 0x68e   :  { %v1232_v30 = vpop.eup %1231 }
 0x68f   :  { %v589_v31 = vadd.f32 1.0, %v1232_v30 }
 0x691   :  { %1233 = vrcp.f32 %v589_v31 }
 0x69e   :  { %v1234_v32 = vpop.eup %1233 }
 0x69f   :  { %593 = vrot.lane.b32.xlu0 %v1234_v32, %s1330_s3 }
 0x6a3   :  { %597 = vrot.lane.b32.xlu0 %v1234_v32, %s1329_s27 }
 0x6ff   :  { %v596_v33 = vpop.permute.xlu1 %595 }
 0x700   :  { %v600_v35 = vmul.f32 %v1234_v32, %v596_v33 }
 0x711   :  { %v594_v34 = vpop.permute.xlu0 %593 }
 0x712   :  { %v599_v36 = vmul.f32 %v594_v34, %v508_v20 }
 0x714   :  { %v601_v37 = vadd.f32 %v600_v35, %v599_v36 }
 0x715   :  { %v598_v39 = vpop.permute.xlu0 %597 }
 0x716   :  { %1235 = vtanh.f32 %v601_v37 }
 0x723   :  { %v1236_v38 = vpop.eup %1235 }
 0x724   :  { %v603_v40 = vmul.f32 %v1236_v38, %v598_v39 }
 0x726   :  { %1154 = vmatmul.mubr.msk.f32.vlgmr.msra.gmra.mxu0 %vm139_vm3, %v603_v40 }
 0x727   :  { %1168 = vmatpush3.msra.mxu0 %v1402_v3  ;;  %1175 = vmatprep.mubr.msk.f32.mxu0 %vm1328_vm2, %v1327_v4 }
 0x728   :  { %1169 = vmatprep.subr.mxu0 %v1327_v4 }
 0x729   :  { %1170 = vmatpush3.msra.mxu0 %v1408_v5 }
 0x72a   :  { %1171 = vmatprep.subr.mxu0 %v1327_v4 }
 0x72b   :  { %1172 = vmatpush3.msra.mxu0 %v1415_v6 }
 0x72c   :  { %1173 = vmatprep.subr.mxu0 %v1327_v4 }
 0x72d   :  { %1174 = vmatpush3.msra.mxu0 %v1425_v7 }
 0x7e6   :  { %v674_v42 = vpop.f32.mrf.mxu0 }
 0x7e7   :  { %v678_v43 = vadd.f32 %v674_v42, %v604_v41 }
 0x7e8   :  { %v1155_v44 = vpop.f32.mrf.mxu0 }
 0x7e9   :  { %v1030_v3 = vmul.f32 -1.442695, %v678_v43  ;;  %1237 = vtanh.f32 %v678_v43 }
 0x7eb   :  { %1239 = vpow2.f32 %v1030_v3 }
 0x7f6   :  { %v1238_v45 = vpop.eup %1237 }
 0x7f7   :  { %688 = vrot.lane.b32.xlu0 %v1238_v45, %s1331_s28 }
 0x7f8   :  { %v1240_v46 = vpop.eup %1239 }
 0x7f9   :  { %v682_v5 = vadd.f32 1.0, %v1240_v46 }
 0x7fb   :  { %1241 = vrcp.f32 %v682_v5 }
 0x808   :  { %v1242_v47 = vpop.eup %1241 }
 0x809   :  { %686 = vrot.lane.b32.xlu1 %v1242_v47, %s1330_s3 }
 0x80d   :  { %690 = vrot.lane.b32.xlu1 %v1242_v47, %s1329_s27 }
 0x869   :  { %v689_v6 = vpop.permute.xlu0 %688 }
 0x86a   :  { %v693_v48 = vmul.f32 %v1242_v47, %v689_v6 }
 0x87b   :  { %v687_v7 = vpop.permute.xlu1 %686 }
 0x87c   :  { %v692_v49 = vmul.f32 %v687_v7, %v601_v37 }
 0x87e   :  { %v694_v50 = vadd.f32 %v693_v48, %v692_v49 }
 0x87f   :  { %v691_v52 = vpop.permute.xlu1 %690 }
 0x880   :  { %1243 = vtanh.f32 %v694_v50 }
 0x88d   :  { %v1244_v51 = vpop.eup %1243 }
 0x88e   :  { %v696_v53 = vmul.f32 %v1244_v51, %v691_v52 }
 0x890   :  { %1165 = vmatmul.mubr.msk.f32.vlgmr.msra.gmra.mxu1 %vm139_vm3, %v696_v53 }
 0x891   :  { %1186 = vmatprep.mubr.msk.f32.mxu1 %vm1328_vm2, %v1327_v4  ;;  %1179 = vmatpush3.msra.mxu1 %v886_v21 }
 0x892   :  { %1180 = vmatprep.subr.mxu1 %v1327_v4 }
 0x893   :  { %1181 = vmatpush3.msra.mxu1 %v885_v22 }
 0x894   :  { %1182 = vmatprep.subr.mxu1 %v1327_v4 }
 0x895   :  { %1183 = vmatpush3.msra.mxu1 %v884_v23 }
 0x896   :  { %1184 = vmatprep.subr.mxu1 %v1327_v4 }
 0x897   :  { %1185 = vmatpush3.msra.mxu1 %v883_v24 }
 0x950   :  { %v767_v55 = vpop.f32.mrf.mxu1 }
 0x951   :  { %v771_v56 = vadd.f32 %v767_v55, %v697_v54 }
 0x952   :  { %v1166_v57 = vpop.f32.mrf.mxu1 }
 0x953   :  { %v1032_v58 = vmul.f32 -1.442695, %v771_v56  ;;  %1245 = vtanh.f32 %v771_v56 }
 0x955   :  { %1247 = vpow2.f32 %v1032_v58 }
 0x960   :  { %v1246_v59 = vpop.eup %1245 }
 0x961   :  { %781 = vrot.lane.b32.xlu1 %v1246_v59, %s1331_s28 }
 0x962   :  { %v1248_v60 = vpop.eup %1247 }
 0x963   :  { %v775_v61 = vadd.f32 1.0, %v1248_v60 }
 0x965   :  { %1249 = vrcp.f32 %v775_v61 }
 0x972   :  { %v1250_v62 = vpop.eup %1249 }
 0x973   :  { %779 = vrot.lane.b32.xlu0 %v1250_v62, %s1330_s3 }
 0x977   :  { %783 = vrot.lane.b32.xlu0 %v1250_v62, %s1329_s27 }
 0x9d3   :  { %v782_v63 = vpop.permute.xlu1 %781 }
 0x9d4   :  { %v786_v1 = vmul.f32 %v1250_v62, %v782_v63 }
 0x9e5   :  { %v780_v0 = vpop.permute.xlu0 %779 }
 0x9e6   :  { %v785_v2 = vmul.f32 %v780_v0, %v694_v50 }
 0x9e8   :  { %v787_v8 = vadd.f32 %v786_v1, %v785_v2 }
 0x9e9   :  { %v784_v10 = vpop.permute.xlu0 %783 }
 0x9ea   :  { %1251 = vtanh.f32 %v787_v8 }
 0x9f7   :  { %v1252_v9 = vpop.eup %1251 }
 0x9f8   :  { %v789_v11 = vmul.f32 %v1252_v9, %v784_v10 }
 0x9fa   :  { %1176 = vmatmul.mubr.msk.f32.vlgmr.msra.gmra.mxu0 %vm139_vm3, %v789_v11 }
 0xaba   :  { %v860_v13 = vpop.f32.mrf.mxu0 }
 0xabb   :  { %v864_v14 = vadd.f32 %v860_v13, %v790_v12 }
 0xabc   :  { %v1177_v15 = vpop.f32.mrf.mxu0 }
 0xabd   :  { %v1034_v16 = vmul.f32 -1.442695, %v864_v14  ;;  %1253 = vtanh.f32 %v864_v14 }
 0xabf   :  { %1255 = vpow2.f32 %v1034_v16 }
 0xaca   :  { %v1254_v17 = vpop.eup %1253 }
 0xacb   :  { %874 = vrot.lane.b32.xlu0 %v1254_v17, %s1331_s28 }
 0xacc   :  { %v1256_v18 = vpop.eup %1255 }
 0xacd   :  { %v868_v19 = vadd.f32 1.0, %v1256_v18 }
 0xacf   :  { %1257 = vrcp.f32 %v868_v19 }
 0xadc   :  { %v1258_v20 = vpop.eup %1257 }
 0xadd   :  { %872 = vrot.lane.b32.xlu1 %v1258_v20, %s1330_s3 }
 0xae1   :  { %876 = vrot.lane.b32.xlu1 %v1258_v20, %s1329_s27 }
 0xb3d   :  { %v875_v25 = vpop.permute.xlu0 %874 }
 0xb3e   :  { %v879_v27 = vmul.f32 %v1258_v20, %v875_v25 }
 0xb4f   :  { %v873_v26 = vpop.permute.xlu1 %872 }
 0xb50   :  { %v878_v28 = vmul.f32 %v873_v26, %v787_v8 }
 0xb52   :  { %v880_v29 = vadd.f32 %v879_v27, %v878_v28 }
 0xb53   :  { %v877_v31 = vpop.permute.xlu1 %876 }
 0xb54   :  { %1259 = vtanh.f32 %v880_v29  ;;  %973 = vst.msk [vmem:[#allocation7] sm:$0x3] %vm971_vm4, %v880_v29 }
 0xb61   :  { %v1260_v30 = vpop.eup %1259 }
 0xb62   :  { %v882_v32 = vmul.f32 %v1260_v30, %v877_v31 }
 0xb64   :  { %1187 = vmatmul.mubr.msk.f32.vlgmr.msra.gmra.mxu1 %vm139_vm3, %v882_v32  ;;  %972 = vst.msk [vmem:[#allocation5] sm:$0x3] %vm971_vm4, %v882_v32 }
 0xb65   :  { %1274 = shalt.err (!%p1271_p4)
}
 0xb66   :  { %993 = dma.vmem_to_hbm [thread:$0]  %s991_s19, 32, %s1580_s9, [#allocation6]  }
 0xb67   :  { %s1333_s21 = smov [#allocation7]  }
 0xb68   :  { %s1000_s0 = sshll.u32 %s1333_s21, 4  ;;  %s1001_s0 = int_to_ptr.vmem [resolvable:$true] %s1000_s0 }
 0xb69   :  { %s1283_s22 = scalar_lea.vmem %s1001_s0, 32  ;;  %p1288_p6 = scmp.lt.s32.totalorder %s1001_s0, %s1001_s0 }
 0xb6a   :  { %p1284_p5 = scmp.ne.s32.totalorder %s1001_s0, %s1283_s22  ;;  %p1289_p7 = scmp.lt.s32.totalorder %s1283_s22, %s1283_s22 }
 0xb6c   :  { %p1290_p8 = por %p1289_p7, %p1288_p6 }
 0xb6e   :  { %p1291_p9 = pnand %p1290_p8, %p1284_p5 }
 0xb70   :  { %1294 = shalt.err (!%p1291_p9)
}
 0xb71   :  { %1003 = dma.vmem_to_hbm [thread:$0]  %s1001_s0, 32, %s1581_s10, [#allocation6]   ;;  %v1035_v4 = vld [vmem:[%s1576_s5] ss:$0 sm:$0xff]  ;;  %vm969_vm5 = vcmask 17408  }
 0xb72   :  { %s1334_s9 = smov [#allocation3]  }
 0xb73   :  { %s980_s2 = sshll.u32 %s1334_s9, 4  ;;  %s981_s2 = int_to_ptr.vmem [resolvable:$true] %s980_s2 }
 0xb74   :  { %s1303_s6 = scalar_lea.vmem %s981_s2, 32  ;;  %p1308_p11 = scmp.lt.s32.totalorder %s981_s2, %s981_s2 }
 0xb75   :  { %p1304_p10 = scmp.ne.s32.totalorder %s981_s2, %s1303_s6  ;;  %p1309_p12 = scmp.lt.s32.totalorder %s1303_s6, %s1303_s6 }
 0xb77   :  { %p1310_p13 = por %p1309_p12, %p1308_p11 }
 0xb79   :  { %p1311_p0 = pnand %p1310_p13, %p1304_p10 }
 0xc24   :  { %v963_v33 = vpop.f32.mrf.mxu1 }
 0xc25   :  { %v964_v34 = vadd.f32 %v1035_v4, %v963_v33 }
 0xc26   :  { %v1188_v35 = vpop.f32.mrf.mxu1 }
 0xc27   :  { %v967_v36 = vmul.f32 1.442695, %v964_v34 }
 0xc29   :  { %1261 = vpow2.f32 %v967_v36 }
 0xc36   :  { %v1262_v37 = vpop.eup %1261 }
 0xc37   :  { %970 = vst.msk [vmem:[#allocation3] sm:$0x3] %vm969_vm5, %v1262_v37 }
 0xc38   :  { %1314 = shalt.err (!%p1311_p0)
}
 0xc39   :  { %983 = dma.vmem_to_hbm [thread:$0]  %s981_s2, 32, %s1579_s8, [#allocation4]  }
 0xc3a   :  { %1323 = dma.done.wait [#allocation4], 32  }
 0xc3b   :  { %1324 = vsyncadd [#allocation4], 4294967264 }
 0xc3c   :  { %1325 = dma.done.wait [#allocation6], 64  }
 0xc3d   :  { %1326 = vsyncadd [#allocation6], 4294967232 }
 0xc3e   :  { %1013 = vsyncpa [#allocation4], 1 }
 0xc3f   :  { %1014 = vsyncpa [#allocation6], 1 }

</bundles_post_ra>
